<compile_context>
chip_gen: v7x
topology: tpu7x:2x2x1
jax: 0.10.0
libtpu: 0.0.40
codegen_flags: <defaults>
</compile_context>

<pallas_src>
import functools

import jax
import jax.numpy as jnp
from jax.experimental import pallas as pl
from jax.experimental.pallas import tpu as pltpu

EMB_DIM = 50
WINDOW = 5
INPUT_SIZE = EMB_DIM * WINDOW      # 250
HIDDEN_SIZE = 150
OUTPUT_SIZE = 5                    # len(labels_vocab); "ner" -> 5

# MXU / lane-friendly padded sizes (padding is exact, see header comment).
K_PAD = 256                        # 250 -> 256
H_PAD = 256                        # 150 -> 256
OUT_PAD = 128                      # 5   -> 128 (lane-dense output slab)


def _round_up(x, m):
    return (x + m - 1) // m * m


def tagger_mlp_kernel(x_ref, w1_ref, b1_ref, w2_ref, b2_ref, o_ref):
    # x: (TILE_B, K_PAD) bf16 -- pre-summed word+prefix+suffix window embeddings
    x = x_ref[...]
    # in_linear + tanh  (bf16 MXU inputs, f32 accumulation / bias / activation)
    h = jnp.dot(x, w1_ref[...], preferred_element_type=jnp.float32) + b1_ref[...]
    h = jnp.tanh(h)                                                  # (TILE_B, H_PAD) f32
    # out_linear -> lane-dense (TILE_B, 128) logits slab (cols >= 5 are zeros)
    o_ref[...] = (jnp.dot(h.astype(jnp.bfloat16), w2_ref[...],
                          preferred_element_type=jnp.float32) + b2_ref[...])


def prepare_params(raw):
    """One-time host-side prep: pad ragged dims and cast matmul weights to bf16."""
    W1 = jnp.zeros((K_PAD, H_PAD), jnp.float32)
    W1 = W1.at[:INPUT_SIZE, :HIDDEN_SIZE].set(raw["W1"])
    b1 = jnp.zeros((1, H_PAD), jnp.float32).at[:, :HIDDEN_SIZE].set(raw["b1"])
    W2 = jnp.zeros((H_PAD, OUT_PAD), jnp.float32)
    W2 = W2.at[:HIDDEN_SIZE, :OUTPUT_SIZE].set(raw["W2"])
    b2 = jnp.zeros((1, OUT_PAD), jnp.float32).at[:, :OUTPUT_SIZE].set(raw["b2"])
    return {
        "E_w": raw["E_w"], "E_p": raw["E_p"], "E_s": raw["E_s"],
        "W1": W1.astype(jnp.bfloat16), "b1": b1,
        "W2": W2.astype(jnp.bfloat16), "b2": b2,
    }


@functools.partial(jax.jit, static_argnames=("tile_b",))
def tagger_forward(x_idx, pref_idx, suf_idx, params, tile_b=512):
    """x_idx/pref_idx/suf_idx: (B, 5) int32 index windows. Returns (B, 5) f32 logits."""
    B = x_idx.shape[0]

    # Glue: embedding lookups, flatten to (B, 250), and pre-sum the 3 streams
    # (matches emb(x).view(-1,250) + emb(pref).view(-1,250) + emb(suf).view(-1,250)).
    x = (jnp.take(params["E_w"], x_idx, axis=0).reshape(B, INPUT_SIZE)
         + jnp.take(params["E_p"], pref_idx, axis=0).reshape(B, INPUT_SIZE)
         + jnp.take(params["E_s"], suf_idx, axis=0).reshape(B, INPUT_SIZE))

    # Batch tiling: multiple of 8 sublanes, capped by VMEM-friendly tile_b.
    tile = max(8, min(tile_b, _round_up(B, 8)))
    Bp = _round_up(B, tile)
    x = jnp.pad(x, ((0, Bp - B), (0, K_PAD - INPUT_SIZE))).astype(jnp.bfloat16)

    resident = lambda shape: pl.BlockSpec(shape, lambda i: (0, 0))  # weights stay in VMEM

    out = pl.pallas_call(
        tagger_mlp_kernel,
        out_shape=jax.ShapeDtypeStruct((Bp, OUT_PAD), jnp.float32),
        grid=(Bp // tile,),
        in_specs=[
            pl.BlockSpec((tile, K_PAD), lambda i: (i, 0)),   # activation: batch-tiled
            resident((K_PAD, H_PAD)),                        # W1 (bf16)
            resident((1, H_PAD)),                            # b1 (f32)
            resident((H_PAD, OUT_PAD)),                      # W2 (bf16)
            resident((1, OUT_PAD)),                          # b2 (f32)
        ],
        out_specs=pl.BlockSpec((tile, OUT_PAD), lambda i: (i, 0)),
        compiler_params=pltpu.CompilerParams(
            dimension_semantics=("parallel",)),              # shards batch over 2 TCs on v7x
    )(x, params["W1"], params["b1"], params["W2"], params["b2"])

    return out[:B, :OUTPUT_SIZE]


def init_params(key, vocab_size=100, pref_vocab_size=60, suf_vocab_size=60):
    ks = jax.random.split(key, 7)
    scale = 0.1
    return {
        "E_w": scale * jax.random.normal(ks[0], (vocab_size, EMB_DIM), jnp.float32),
        "E_p": scale * jax.random.normal(ks[1], (pref_vocab_size, EMB_DIM), jnp.float32),
        "E_s": scale * jax.random.normal(ks[2], (suf_vocab_size, EMB_DIM), jnp.float32),
        "W1":  scale * jax.random.normal(ks[3], (INPUT_SIZE, HIDDEN_SIZE), jnp.float32),
        "b1":  scale * jax.random.normal(ks[4], (1, HIDDEN_SIZE), jnp.float32),
        "W2":  scale * jax.random.normal(ks[5], (HIDDEN_SIZE, OUTPUT_SIZE), jnp.float32),
        "b2":  scale * jax.random.normal(ks[6], (1, OUTPUT_SIZE), jnp.float32),
    }


if __name__ == "__main__":
    key = jax.random.PRNGKey(0)
    kp, k1, k2, k3 = jax.random.split(key, 4)

    raw = init_params(kp)
    params = prepare_params(raw)

    # Small deterministic test: B=100 (non-multiple of the tile to exercise
    # padding + slicing), tile_b=32 to exercise a multi-step pipelined grid.
    B = 100
    x_idx = jax.random.randint(k1, (B, WINDOW), 0, raw["E_w"].shape[0], jnp.int32)
    pref_idx = jax.random.randint(k2, (B, WINDOW), 0, raw["E_p"].shape[0], jnp.int32)
    suf_idx = jax.random.randint(k3, (B, WINDOW), 0, raw["E_s"].shape[0], jnp.int32)

    out = tagger_forward(x_idx, pref_idx, suf_idx, params, tile_b=32)
    jax.block_until_ready(out)

    # Pure-JAX f32 reference of the original forward pass.
    def ref(x, p, s):
        xe = jnp.take(raw["E_w"], x, axis=0).reshape(B, INPUT_SIZE)
        pe = jnp.take(raw["E_p"], p, axis=0).reshape(B, INPUT_SIZE)
        se = jnp.take(raw["E_s"], s, axis=0).reshape(B, INPUT_SIZE)
        h = jnp.tanh((xe + pe + se) @ raw["W1"] + raw["b1"])
        return h @ raw["W2"] + raw["b2"]

    expected = ref(x_idx, pref_idx, suf_idx)
    assert out.shape == (B, OUTPUT_SIZE)
    # bf16 MXU inputs with f32 accumulation -> loose-but-safe tolerance vs f32 ref.
    max_err = jnp.max(jnp.abs(out - expected))
    assert jnp.allclose(out, expected, atol=3e-2, rtol=3e-2), f"max_err={max_err}"
    print("KERNEL_OK")
</pallas_src>

<mosaic_0001>
module attributes {stable_mosaic.version = 11 : i64} {
  func.func @tagger_mlp_kernel(%arg0: i32, %arg1: memref<32x256xbf16, #tpu.memory_space<vmem>>, %arg2: memref<256x256xbf16, #tpu.memory_space<vmem>>, %arg3: memref<1x256xf32, #tpu.memory_space<vmem>>, %arg4: memref<256x128xbf16, #tpu.memory_space<vmem>>, %arg5: memref<1x128xf32, #tpu.memory_space<vmem>>, %arg6: memref<32x128xf32, #tpu.memory_space<vmem>>) attributes {dimension_semantics = [#tpu.dimension_semantics<parallel>], iteration_bounds = array<i64: 4>, scalar_prefetch = 0 : i64, scratch_operands = 0 : i64, tpu.core_type = #tpu.core_type<tc>, window_params = [{transform_indices = @transform_0, window_bounds = array<i64: 32, 256>}, {pipeline_mode = #tpu.pipeline_mode<synchronous>, transform_indices = @transform_1, window_bounds = array<i64: 256, 256>}, {pipeline_mode = #tpu.pipeline_mode<synchronous>, transform_indices = @transform_2, window_bounds = array<i64: 1, 256>}, {pipeline_mode = #tpu.pipeline_mode<synchronous>, transform_indices = @transform_3, window_bounds = array<i64: 256, 128>}, {pipeline_mode = #tpu.pipeline_mode<synchronous>, transform_indices = @transform_4, window_bounds = array<i64: 1, 128>}, {transform_indices = @transform_5, window_bounds = array<i64: 32, 128>}]} {
    %c0 = arith.constant 0 : index
    %c0_0 = arith.constant 0 : index
    %0 = vector.load %arg1[%c0, %c0_0] : memref<32x256xbf16, #tpu.memory_space<vmem>>, vector<32x256xbf16>
    %c0_1 = arith.constant 0 : index
    %c0_2 = arith.constant 0 : index
    %1 = vector.load %arg2[%c0_1, %c0_2] : memref<256x256xbf16, #tpu.memory_space<vmem>>, vector<256x256xbf16>
    %cst = arith.constant dense<0.000000e+00> : vector<32x256xf32>
    %2 = tpu.matmul %0, %1, %cst {dimension_numbers = #tpu.dot_dimension_numbers<[1], [0], [0], [1], [0, 0, 1, 1], [], []>} : vector<32x256xbf16>, vector<256x256xbf16>, vector<32x256xf32> -> vector<32x256xf32>
    %c0_3 = arith.constant 0 : index
    %c0_4 = arith.constant 0 : index
    %3 = vector.load %arg3[%c0_3, %c0_4] : memref<1x256xf32, #tpu.memory_space<vmem>>, vector<1x256xf32>
    %4 = vector.broadcast %3 : vector<1x256xf32> to vector<32x256xf32>
    %5 = arith.addf %2, %4 : vector<32x256xf32>
    %6 = math.tanh %5 : vector<32x256xf32>
    %7 = arith.truncf %6 : vector<32x256xf32> to vector<32x256xbf16>
    %c0_5 = arith.constant 0 : index
    %c0_6 = arith.constant 0 : index
    %8 = vector.load %arg4[%c0_5, %c0_6] : memref<256x128xbf16, #tpu.memory_space<vmem>>, vector<256x128xbf16>
    %cst_7 = arith.constant dense<0.000000e+00> : vector<32x128xf32>
    %9 = tpu.matmul %7, %8, %cst_7 {dimension_numbers = #tpu.dot_dimension_numbers<[1], [0], [0], [1], [0, 0, 1, 1], [], []>} : vector<32x256xbf16>, vector<256x128xbf16>, vector<32x128xf32> -> vector<32x128xf32>
    %c0_8 = arith.constant 0 : index
    %c0_9 = arith.constant 0 : index
    %10 = vector.load %arg5[%c0_8, %c0_9] : memref<1x128xf32, #tpu.memory_space<vmem>>, vector<1x128xf32>
    %11 = vector.broadcast %10 : vector<1x128xf32> to vector<32x128xf32>
    %12 = arith.addf %9, %11 : vector<32x128xf32>
    %c0_10 = arith.constant 0 : index
    %c0_11 = arith.constant 0 : index
    %13 = vector.load %arg6[%c0_10, %c0_11] : memref<32x128xf32, #tpu.memory_space<vmem>>, vector<32x128xf32>
    tpu.vector_store %arg6[%c0_10, %c0_11], %12 {strides = array<i32>} : memref<32x128xf32, #tpu.memory_space<vmem>>, vector<32x128xf32>,
    return
  }
  func.func @transform_0(%arg0: i32) -> (i32, i32) {
    %c0_i32 = arith.constant 0 : i32
    %c0_i32_0 = arith.constant 0 : i32
    return %arg0, %c0_i32 : i32, i32
  }
  func.func @transform_1(%arg0: i32) -> (i32, i32) {
    %c0_i32 = arith.constant 0 : i32
    %c0_i32_0 = arith.constant 0 : i32
    %c0_i32_1 = arith.constant 0 : i32
    return %c0_i32, %c0_i32_0 : i32, i32
  }
  func.func @transform_2(%arg0: i32) -> (i32, i32) {
    %c0_i32 = arith.constant 0 : i32
    %c0_i32_0 = arith.constant 0 : i32
    %c0_i32_1 = arith.constant 0 : i32
    return %c0_i32, %c0_i32_0 : i32, i32
  }
  func.func @transform_3(%arg0: i32) -> (i32, i32) {
    %c0_i32 = arith.constant 0 : i32
    %c0_i32_0 = arith.constant 0 : i32
    %c0_i32_1 = arith.constant 0 : i32
    return %c0_i32, %c0_i32_0 : i32, i32
  }
  func.func @transform_4(%arg0: i32) -> (i32, i32) {
    %c0_i32 = arith.constant 0 : i32
    %c0_i32_0 = arith.constant 0 : i32
    %c0_i32_1 = arith.constant 0 : i32
    return %c0_i32, %c0_i32_0 : i32, i32
  }
  func.func @transform_5(%arg0: i32) -> (i32, i32) {
    %c0_i32 = arith.constant 0 : i32
    %c0_i32_0 = arith.constant 0 : i32
    return %arg0, %c0_i32 : i32, i32
  }
}

</mosaic_0001>

<bundles_post_ra>
// kernel: tagger_forward.1
= control target key start
LH: loop header
LB: loop body
LE: loop exit
PB: predicated region body
PF: predicated region fallthrough
CT: control target
= control target key end

     0   :  { %s995_s18 = smov 0   ;;  %s1175_s0 = inlined_call_operand.vmem [shape: bf16[128,256], index: 0, kind: input, shape index: {}]   ;;  %s1176_s1 = inlined_call_operand.vmem [shape: bf16[256,256], index: 1, kind: input, shape index: {}]   ;;  %s1177_s2 = inlined_call_operand.vmem [shape: f32[1,256], index: 2, kind: input, shape index: {}]   ;;  %s1178_s3 = inlined_call_operand.vmem [shape: bf16[256,128], index: 3, kind: input, shape index: {}]   ;;  %s1179_s4 = inlined_call_operand.vmem [shape: f32[1,128], index: 4, kind: input, shape index: {}]   ;;  %s1180_s5 = inlined_call_operand.vmem [shape: f32[128,128], index: 5, kind: output, shape index: {}]  }
   0x1 LB: > { %s769_s19 = sadd.s32 4294967295, %s963_s18   ;;  %p773_p0 = scmp.ge.s32.totalorder %s963_s18, 1  ;;  %s963_s18 = sphi %s995_s18, %s15_s18  }
   0x2   : > { %p189_p1 = scmp.lt.s32.totalorder %s963_s18, 5 }
   0x4   : > { %p190_p2 = pnand %p773_p0, %p189_p1 }
   0x5   : > { %v871_v0 = vld [vmem:[%s1176_s1 + $0x4] ss:$8 sps:$4 sm:$0xff] (!%p190_p2)   ;;  %v873_v1 = vld [vmem:[%s1176_s1] ss:$8 sps:$4 sm:$0xff] (!%p190_p2)   ;;  %v874_v2 = vld [vmem:[%s1176_s1 + $0x14] ss:$8 sps:$4 sm:$0xff] (!%p190_p2)   ;;  %v270_v52 = vlaneseq (!%p190_p2) }
   0x6   : > { %193 = sbr.rel (%p190_p2) target bundleno = 529 (0x211), region = 40  ;;  %460 = vmatprep.subr.bf16.mxu0 (!%p190_p2), %v871_v0  ;;  %v876_v3 = vld [vmem:[%s1176_s1 + $0x10] ss:$8 sps:$4 sm:$0xff] (!%p190_p2)   ;;  %v877_v4 = vld [vmem:[%s1176_s1 + $0x24] ss:$8 sps:$4 sm:$0xff] (!%p190_p2)   ;;  %s774_s30 = sshll.u32 (!%p190_p2), %s769_s19, 2 }
   0x7   : > { %461 = vmatpush1.bf16.msra.mxu0 (!%p190_p2), %v873_v1  ;;  %v879_v5 = vld [vmem:[%s1176_s1 + $0x20] ss:$8 sps:$4 sm:$0xff] (!%p190_p2)   ;;  %v880_v6 = vld [vmem:[%s1176_s1 + $0x34] ss:$8 sps:$4 sm:$0xff] (!%p190_p2)   ;;  %p219_p3 = scmp.lt.s32.totalorder (!%p190_p2), %s774_s30, 15  ;;  %v271_v53 = vshrl.u32 (!%p190_p2), %v270_v52, 7 }
   0x8   : > { %462 = vmatprep.subr.bf16.mxu0 (!%p190_p2), %v874_v2  ;;  %v882_v7 = vld [vmem:[%s1176_s1 + $0x30] ss:$8 sps:$4 sm:$0xff] (!%p190_p2)   ;;  %v883_v8 = vld [vmem:[%s1176_s1 + $0x44] ss:$8 sps:$4 sm:$0xff] (!%p190_p2)   ;;  %v885_v9 = vld [vmem:[%s1176_s1 + $0x40] ss:$8 sps:$4 sm:$0xff] (!%p190_p2)  }
   0x9   : > { %v886_v10 = vld [vmem:[%s1176_s1 + $0x54] ss:$8 sps:$4 sm:$0xff] (!%p190_p2)   ;;  %v888_v11 = vld [vmem:[%s1176_s1 + $0x50] ss:$8 sps:$4 sm:$0xff] (!%p190_p2)   ;;  %v889_v12 = vld [vmem:[%s1176_s1 + $0x64] ss:$8 sps:$4 sm:$0xff] (!%p190_p2)  }
   0xa   : > { %v891_v14 = vld [vmem:[%s1176_s1 + $0x60] ss:$8 sps:$4 sm:$0xff] (!%p190_p2)   ;;  %v892_v15 = vld [vmem:[%s1176_s1 + $0x74] ss:$8 sps:$4 sm:$0xff] (!%p190_p2)   ;;  %v894_v17 = vld [vmem:[%s1176_s1 + $0x70] ss:$8 sps:$4 sm:$0xff] (!%p190_p2)  }
   0xb   : > { %463 = vmatpush1.bf16.msra.mxu0 (!%p190_p2), %v876_v3  ;;  %v925_v16 = vld [vmem:[%s1178_s3 + $0x40] sm:$0xff] (!%p190_p2)   ;;  %v927_v20 = vld [vmem:[%s1178_s3 + $0x48] sm:$0xff] (!%p190_p2)   ;;  %v929_v22 = vld [vmem:[%s1178_s3 + $0x50] sm:$0xff] (!%p190_p2)   ;;  %v272_v54 = vsub.s32 (!%p190_p2), 0, %v271_v53  ;;  %v276_v56 = vsub.s32 (!%p190_p2), 1, %v271_v53 }
   0xc   : > { %464 = vmatprep.subr.bf16.mxu0 (!%p190_p2), %v877_v4  ;;  %v926_v18 = vld [vmem:[%s1178_s3] sm:$0xff] (!%p190_p2)   ;;  %835 = vmatprep.subr.bf16.mxu1 (!%p190_p2), %v925_v16  ;;  %v928_v21 = vld [vmem:[%s1178_s3 + $0x8] sm:$0xff] (!%p190_p2)   ;;  %v898_v24 = vld [vmem:[%s1176_s1 + $0x94] ss:$8 sps:$4 sm:$0xff] (!%p190_p2)  }
   0xd   : > { %s1182_s30 = smov (!%p219_p3, %s774_s30), 15  ;;  %v895_v19 = vld [vmem:[%s1176_s1 + $0x84] ss:$8 sps:$4 sm:$0xff]   ;;  %836 = vmatpush3.bf16.msra.mxu1 %v926_v18  ;;  %v897_v23 = vld [vmem:[%s1176_s1 + $0x80] ss:$8 sps:$4 sm:$0xff]   ;;  %v930_v25 = vld [vmem:[%s1178_s3 + $0x10] sm:$0xff]  }
   0xe   : > { %s834_s19 = sshll.u32 %s1182_s30, 3  ;;  %837 = vmatprep.subr.bf16.mxu1 %v927_v20  ;;  %v900_v26 = vld [vmem:[%s1176_s1 + $0x90] ss:$8 sps:$4 sm:$0xff]   ;;  %v901_v27 = vld [vmem:[%s1176_s1 + $0xa4] ss:$8 sps:$4 sm:$0xff]  }
   0xf   : > { %465 = vmatpush1.bf16.msra.mxu0 %v879_v5  ;;  %s1047_s24 = scalar_lea.vmem %s1175_s0, %s834_s19  ;;  %v903_v28 = vld [vmem:[%s1176_s1 + $0xa0] ss:$8 sps:$4 sm:$0xff]   ;;  %v904_v29 = vld [vmem:[%s1176_s1 + $0xb4] ss:$8 sps:$4 sm:$0xff]   ;;  %v906_v30 = vld [vmem:[%s1176_s1 + $0xb0] ss:$8 sps:$4 sm:$0xff]   ;;  %s229_s15 = scalar_lea.vmem %s1180_s5, %s834_s19 }
  0x10   : > { %466 = vmatprep.subr.bf16.mxu0 %v880_v6  ;;  %v921_v13 = vld [vmem:[%s1047_s24 + $0x4] ss:$8 sps:$4 sm:$0xff]   ;;  %v909_v32 = vld [vmem:[%s1176_s1 + $0xc0] ss:$8 sps:$4 sm:$0xff]   ;;  %v910_v33 = vld [vmem:[%s1176_s1 + $0xd4] ss:$8 sps:$4 sm:$0xff]  }
  0x11   : > { %492 = vmatprep.mubr.bf16.mxu0 %v921_v13  ;;  %838 = vmatpush3.bf16.msra.mxu1 %v928_v21  ;;  %v907_v31 = vld [vmem:[%s1176_s1 + $0xc4] ss:$8 sps:$4 sm:$0xff]   ;;  %v912_v34 = vld [vmem:[%s1176_s1 + $0xd0] ss:$8 sps:$4 sm:$0xff]   ;;  %v915_v36 = vld [vmem:[%s1176_s1 + $0xe0] ss:$8 sps:$4 sm:$0xff]  }
  0x12   : > { %839 = vmatprep.subr.bf16.mxu1 %v929_v22  ;;  %v913_v35 = vld [vmem:[%s1176_s1 + $0xe4] ss:$8 sps:$4 sm:$0xff]   ;;  %v916_v37 = vld [vmem:[%s1176_s1 + $0xf4] ss:$8 sps:$4 sm:$0xff]   ;;  %v918_v38 = vld [vmem:[%s1176_s1 + $0xf0] ss:$8 sps:$4 sm:$0xff]  }
  0x13   : > { %467 = vmatpush1.bf16.msra.mxu0 %v882_v7  ;;  %v919_v39 = vld [vmem:[%s1047_s24] ss:$8 sps:$4 sm:$0xff]   ;;  %v922_v40 = vld [vmem:[%s1047_s24 + $0x14] ss:$8 sps:$4 sm:$0xff]   ;;  %v924_v41 = vld [vmem:[%s1047_s24 + $0x10] ss:$8 sps:$4 sm:$0xff]  }
  0x14   : > { %468 = vmatprep.subr.bf16.mxu0 %v883_v8  ;;  %v931_v42 = vld [vmem:[%s1178_s3 + $0x58] sm:$0xff]   ;;  %v933_v44 = vld [vmem:[%s1178_s3 + $0x60] sm:$0xff]   ;;  %v935_v46 = vld [vmem:[%s1178_s3 + $0x68] sm:$0xff]  }
  0x15   : > { %840 = vmatpush3.bf16.msra.mxu1 %v930_v25  ;;  %v932_v43 = vld [vmem:[%s1178_s3 + $0x18] sm:$0xff]   ;;  %v934_v45 = vld [vmem:[%s1178_s3 + $0x20] sm:$0xff]   ;;  %v936_v47 = vld [vmem:[%s1178_s3 + $0x28] sm:$0xff]  }
  0x16   : > { %841 = vmatprep.subr.bf16.mxu1 %v931_v42  ;;  %v937_v48 = vld [vmem:[%s1178_s3 + $0x70] sm:$0xff]   ;;  %v939_v50 = vld [vmem:[%s1178_s3 + $0x78] sm:$0xff]   ;;  %v268_v55 = vld [vmem:[%s1177_s2] sm:$0x3] }
  0x17   : > { %469 = vmatpush1.bf16.msra.mxu0 %v885_v9  ;;  %v938_v49 = vld [vmem:[%s1178_s3 + $0x30] sm:$0xff]   ;;  %v940_v51 = vld [vmem:[%s1178_s3 + $0x38] sm:$0xff]   ;;  %v273_v57 = vrot.slane %v268_v55, %v272_v54  ;;  %v277_v58 = vrot.slane %v268_v55, %v276_v56 }
  0x18   : > { %470 = vmatprep.subr.bf16.mxu0 %v886_v10 }
  0x19   : > { %842 = vmatpush3.bf16.msra.mxu1 %v932_v43 }
  0x1a   : > { %843 = vmatprep.subr.bf16.mxu1 %v933_v44 }
  0x1b   : > { %471 = vmatpush1.bf16.msra.mxu0 %v888_v11 }
  0x1c   : > { %472 = vmatprep.subr.bf16.mxu0 %v889_v12 }
  0x1d   : > { %844 = vmatpush3.bf16.msra.mxu1 %v934_v45 }
  0x1e   : > { %845 = vmatprep.subr.bf16.mxu1 %v935_v46 }
  0x1f   : > { %473 = vmatpush1.bf16.msra.mxu0 %v891_v14 }
  0x20   : > { %474 = vmatprep.subr.bf16.mxu0 %v892_v15 }
  0x21   : > { %846 = vmatpush3.bf16.msra.mxu1 %v936_v47 }
  0x22   : > { %847 = vmatprep.subr.bf16.mxu1 %v937_v48 }
  0x23   : > { %475 = vmatpush1.bf16.msra.mxu0 %v894_v17 }
  0x24   : > { %476 = vmatprep.subr.bf16.mxu0 %v895_v19 }
  0x25   : > { %848 = vmatpush3.bf16.msra.mxu1 %v938_v49 }
  0x26   : > { %849 = vmatprep.subr.bf16.mxu1 %v939_v50 }
  0x27   : > { %477 = vmatpush1.bf16.msra.mxu0 %v897_v23 }
  0x28   : > { %478 = vmatprep.subr.bf16.mxu0 %v898_v24  ;;  %v815_v24 = vld [vmem:[%s1179_s4] ss:$0 sm:$0xff] }
  0x29   : > { %850 = vmatpush3.bf16.msra.mxu1 %v940_v51 }
  0x2b   : > { %479 = vmatpush1.bf16.msra.mxu0 %v900_v26 }
  0x2c   : > { %480 = vmatprep.subr.bf16.mxu0 %v901_v27 }
  0x2f   : > { %481 = vmatpush1.bf16.msra.mxu0 %v903_v28 }
  0x30   : > { %482 = vmatprep.subr.bf16.mxu0 %v904_v29 }
  0x33   : > { %483 = vmatpush1.bf16.msra.mxu0 %v906_v30 }
  0x34   : > { %484 = vmatprep.subr.bf16.mxu0 %v907_v31 }
  0x37   : > { %485 = vmatpush1.bf16.msra.mxu0 %v909_v32 }
  0x38   : > { %486 = vmatprep.subr.bf16.mxu0 %v910_v33 }
  0x3b   : > { %487 = vmatpush1.bf16.msra.mxu0 %v912_v34 }
  0x3c   : > { %488 = vmatprep.subr.bf16.mxu0 %v913_v35 }
  0x3f   : > { %489 = vmatpush1.bf16.msra.mxu0 %v915_v36 }
  0x40   : > { %490 = vmatprep.subr.bf16.mxu0 %v916_v37 }
  0x43   : > { %491 = vmatpush1.bf16.msra.mxu0 %v918_v38 }
  0x46   : > { %493 = vmatmul.mubr.bf16.vlgmr.msra.gmra.mrb[0].mxu0 %v919_v39 }
  0x47   : > { %502 = vmatprep.mubr.bf16.mxu0 %v922_v40 }
  0x4e   : > { %503 = vmatmul.mubr.bf16.gmra.mrb[4].mxu0 %v924_v41 }
 0x119   : > { %v494_v59 = vpop.f32.mrb[0].mxu0 }
 0x11a   : > { %v495_v60 = vadd.f32 %v494_v59, %v273_v57  ;;  %v496_v61 = vpop.f32.mrb[1].mxu0 }
 0x11b   : > { %v497_v62 = vadd.f32 %v496_v61, %v277_v58  ;;  %v498_v63 = vpop.f32.mrb[2].mxu0 }
 0x11c   : > { %941 = vtanh.f32 %v495_v60  ;;  %v499_v0 = vadd.f32 %v498_v63, %v273_v57  ;;  %v500_v1 = vpop.f32.mrb[3].mxu0 }
 0x11d   : > { %943 = vtanh.f32 %v497_v62  ;;  %v501_v2 = vadd.f32 %v500_v1, %v277_v58 }
 0x11e   : > { %945 = vtanh.f32 %v499_v0 }
 0x11f   : > { %947 = vtanh.f32 %v501_v2 }
 0x121   : > { %v504_v3 = vpop.f32.mrb[4].mxu0 }
 0x122   : > { %v505_v4 = vadd.f32 %v504_v3, %v273_v57  ;;  %v506_v5 = vpop.f32.mrb[5].mxu0 }
 0x123   : > { %v507_v6 = vadd.f32 %v506_v5, %v277_v58  ;;  %v508_v7 = vpop.f32.mrb[6].mxu0 }
 0x124   : > { %949 = vtanh.f32 %v505_v4  ;;  %v509_v8 = vadd.f32 %v508_v7, %v273_v57  ;;  %v510_v9 = vpop.f32.mrb[7].mxu0 }
 0x125   : > { %951 = vtanh.f32 %v507_v6  ;;  %v511_v10 = vadd.f32 %v510_v9, %v277_v58 }
 0x126   : > { %v942_v11 = vpop.eup %941  ;;  %953 = vtanh.f32 %v509_v8 }
 0x127   : > { %v944_v12 = vpop.eup %943  ;;  %955 = vtanh.f32 %v511_v10 }
 0x128   : > { %v946_v13 = vpop.eup %945 }
 0x129   : > { %v948_v14 = vpop.eup %947  ;;  %v521_v15 = vpack.c.bf16 %v946_v13, %v942_v11 }
 0x12a   : > { %v522_v16 = vpack.c.bf16 %v948_v14, %v944_v12 }
 0x12c   : > { %692 = vmatprep.mubr.bf16.mxu1 %v522_v16 }
 0x12d   : > { %693 = vmatmul.mubr.bf16.vlgmr.msra.gmra.mrb[0].mxu1 %v521_v15 }
 0x12e   : > { %v950_v17 = vpop.eup %949 }
 0x12f   : > { %v952_v18 = vpop.eup %951 }
 0x130   : > { %v954_v19 = vpop.eup %953 }
 0x131   : > { %v956_v20 = vpop.eup %955  ;;  %v523_v21 = vpack.c.bf16 %v954_v19, %v950_v17 }
 0x132   : > { %v524_v22 = vpack.c.bf16 %v956_v20, %v952_v18 }
 0x134   : > { %700 = vmatprep.mubr.bf16.mxu1 %v524_v22 }
 0x135   : > { %701 = vmatmul.mubr.bf16.gmra.mrb[4].mxu1 %v523_v21 }
 0x200   : > { %v851_v23 = vpop.f32.mrb[0].mxu1 }
 0x201   : > { %v852_v25 = vpop.f32.mrb[1].mxu1 }
 0x202   : > { %v853_v26 = vadd.f32 %v852_v25, %v851_v23  ;;  %v854_v27 = vpop.f32.mrb[2].mxu1 }
 0x203   : > { %v855_v28 = vpop.f32.mrb[3].mxu1 }
 0x204   : > { %v695_v29 = vadd.f32 %v853_v26, %v815_v24  ;;  %v856_v30 = vadd.f32 %v855_v28, %v854_v27 }
 0x206   : > { %709 = vst [vmem:[%s229_s15] sm:$0xff] %v695_v29  ;;  %v698_v31 = vadd.f32 %v856_v30, %v815_v24 }
 0x208   : > { %710 = vst [vmem:[%s229_s15 + $0x8] sm:$0xff] %v698_v31  ;;  %v857_v32 = vpop.f32.mrb[4].mxu1 }
 0x209   : > { %v858_v33 = vpop.f32.mrb[5].mxu1 }
 0x20a   : > { %v859_v34 = vadd.f32 %v858_v33, %v857_v32  ;;  %v860_v35 = vpop.f32.mrb[6].mxu1 }
 0x20b   : > { %v861_v36 = vpop.f32.mrb[7].mxu1 }
 0x20c   : > { %v703_v37 = vadd.f32 %v859_v34, %v815_v24  ;;  %v862_v38 = vadd.f32 %v861_v36, %v860_v35 }
 0x20e   : > { %711 = vst [vmem:[%s229_s15 + $0x10] sm:$0xff] %v703_v37  ;;  %v706_v39 = vadd.f32 %v862_v38, %v815_v24 }
 0x210   : > { %712 = vst [vmem:[%s229_s15 + $0x18] sm:$0xff] %v706_v39 }
 0x211 PF: > { %s15_s18 = sadd.s32 1, %s963_s18  }
 0x212   : > { %p12_p4 = scmp.ge.s32.totalorder %s15_s18, 6  }
 0x214   :  { %14 = sbr.rel (!%p12_p4) target bundleno = 1 (0x1), region = 70 }

</bundles_post_ra>
